<compile_context>
chip_gen: v7x
topology: tpu7x:2x2x1
jax: 0.10.0
libtpu: 0.0.40
codegen_flags: <defaults>
</compile_context>

<pallas_src>
import math
from functools import partial

import jax
import jax.numpy as jnp
from jax.experimental import pallas as pl
from jax.experimental.pallas import tpu as pltpu


VMEM_LIMIT = 64 * 1024 * 1024  # explicit scoped-VMEM budget (safe on v5e/v6e/v7x)


def _pick_tile(n, candidates):
    """Largest candidate that evenly divides n, else the full extent."""
    for c in candidates:
        if n >= c and n % c == 0:
            return c
    return n


# ----------------------------- Pallas kernels -----------------------------

def _rmsnorm_kernel(x_ref, w_ref, o_ref, *, eps):
    # T5-style layernorm: x / sqrt(mean(x^2) + eps) * weight   (no mean subtraction)
    x = x_ref[...].astype(jnp.float32)                       # (bm, D)
    var = jnp.mean(x * x, axis=-1, keepdims=True)
    y = x * jax.lax.rsqrt(var + eps)
    o_ref[...] = (w_ref[...].astype(jnp.float32) * y).astype(o_ref.dtype)


def rmsnorm(x, w, eps=1e-6):
    """Standalone norm (only used for the outer pre/post-stack layer norms)."""
    orig = x.shape
    D = orig[-1]
    x2 = x.reshape(-1, D)
    M = x2.shape[0]
    bm = _pick_tile(M, (1024, 512, 256, 128, 64, 32, 16, 8))
    out = pl.pallas_call(
        partial(_rmsnorm_kernel, eps=eps),
        out_shape=jax.ShapeDtypeStruct((M, D), x.dtype),
        grid=(M // bm,),
        in_specs=[pl.BlockSpec((bm, D), lambda i: (i, 0)),
                  pl.BlockSpec((1, D), lambda i: (0, 0))],
        out_specs=pl.BlockSpec((bm, D), lambda i: (i, 0)),
        compiler_params=pltpu.CompilerParams(
            dimension_semantics=("parallel",), vmem_limit_bytes=VMEM_LIMIT),
    )(x2, w.reshape(1, D))
    return out.reshape(orig)


def _norm_linear_kernel(x_ref, ln_ref, w_ref, b_ref, o_ref, *, eps, activation):
    # fused T5 rmsnorm + matmul + bias (+ optional relu); bf16 MXU operands, f32 acc.
    x = x_ref[...].astype(jnp.float32)                        # (bm, D)
    var = jnp.mean(x * x, axis=-1, keepdims=True)
    xn = (x * jax.lax.rsqrt(var + eps)) * ln_ref[...].astype(jnp.float32)
    y = jnp.dot(xn.astype(jnp.bfloat16), w_ref[...].astype(jnp.bfloat16),
                preferred_element_type=jnp.float32)
    y = y + b_ref[...].astype(jnp.float32)
    if activation == "relu":
        y = jnp.maximum(y, 0.0)
    o_ref[...] = y.astype(o_ref.dtype)


def fused_norm_linear(x, ln_w, w, b, activation="none", eps=1e-6):
    # x: [..., D], w: [D, N].  Full-K block (norm needs the whole row anyway).
    orig = x.shape
    D = orig[-1]
    N = w.shape[1]
    x2 = x.reshape(-1, D)
    M = x2.shape[0]
    bm = _pick_tile(M, (256, 128, 64, 32, 16, 8))
    bn = _pick_tile(N, (256, 128))
    out = pl.pallas_call(
        partial(_norm_linear_kernel, eps=eps, activation=activation),
        out_shape=jax.ShapeDtypeStruct((M, N), x.dtype),
        grid=(M // bm, N // bn),
        in_specs=[pl.BlockSpec((bm, D), lambda i, j: (i, 0)),
                  pl.BlockSpec((1, D), lambda i, j: (0, 0)),
                  pl.BlockSpec((D, bn), lambda i, j: (0, j)),
                  pl.BlockSpec((1, bn), lambda i, j: (0, j))],
        out_specs=pl.BlockSpec((bm, bn), lambda i, j: (i, j)),
        compiler_params=pltpu.CompilerParams(
            dimension_semantics=("parallel", "parallel"),
            vmem_limit_bytes=VMEM_LIMIT),
    )(x2, ln_w.reshape(1, D), w, b.reshape(1, N))
    return out.reshape(orig[:-1] + (N,))


def _linear_kernel(x_ref, w_ref, b_ref, *rest, activation, has_residual):
    # K-tiled matmul with f32 VMEM accumulator; bias/activation/residual at finalize.
    if has_residual:
        r_ref, o_ref, acc_ref = rest
    else:
        o_ref, acc_ref = rest
        r_ref = None
    k = pl.program_id(2)

    @pl.when(k == 0)
    def _():
        acc_ref[...] = jnp.zeros_like(acc_ref)

    acc_ref[...] += jnp.dot(x_ref[...].astype(jnp.bfloat16),
                            w_ref[...].astype(jnp.bfloat16),
                            preferred_element_type=jnp.float32)

    @pl.when(k == pl.num_programs(2) - 1)
    def _():
        y = acc_ref[...] + b_ref[...].astype(jnp.float32)
        if activation == "relu":
            y = jnp.maximum(y, 0.0)
        if has_residual:
            y = y + r_ref[...].astype(jnp.float32)
        o_ref[...] = y.astype(o_ref.dtype)


def linear(x, w, b, activation="none", residual=None):
    # x: [..., K], w: [K, N], b: [N]; optional residual of shape [..., N] fused in.
    orig = x.shape
    K = orig[-1]
    N = w.shape[1]
    x2 = x.reshape(-1, K)
    M = x2.shape[0]
    bm = _pick_tile(M, (256, 128, 64, 32, 16, 8))
    bn = _pick_tile(N, (256, 128))
    bk = _pick_tile(K, (512, 256, 128))
    has_residual = residual is not None

    in_specs = [pl.BlockSpec((bm, bk), lambda i, j, k: (i, k)),
                pl.BlockSpec((bk, bn), lambda i, j, k: (k, j)),
                pl.BlockSpec((1, bn), lambda i, j, k: (0, j))]
    args = [x2, w, b.reshape(1, N)]
    if has_residual:
        in_specs.append(pl.BlockSpec((bm, bn), lambda i, j, k: (i, j)))
        args.append(residual.reshape(-1, N))

    out = pl.pallas_call(
        partial(_linear_kernel, activation=activation, has_residual=has_residual),
        out_shape=jax.ShapeDtypeStruct((M, N), x.dtype),
        grid=(M // bm, N // bn, K // bk),
        in_specs=in_specs,
        out_specs=pl.BlockSpec((bm, bn), lambda i, j, k: (i, j)),
        scratch_shapes=[pltpu.VMEM((bm, bn), jnp.float32)],
        compiler_params=pltpu.CompilerParams(
            dimension_semantics=("parallel", "parallel", "arbitrary"),
            vmem_limit_bytes=VMEM_LIMIT),
    )(*args)
    return out.reshape(orig[:-1] + (N,))


def _ffn_kernel(x_ref, ln_ref, w1_ref, b1_ref, w2_ref, b2_ref, o_ref, acc_ref, *, eps):
    # fused rmsnorm + ff1 + ReLU + ff2 + residual; FF intermediate stays in VMEM.
    j = pl.program_id(1)

    @pl.when(j == 0)
    def _():
        acc_ref[...] = jnp.zeros_like(acc_ref)

    x = x_ref[...].astype(jnp.float32)                        # (bm, D)
    var = jnp.mean(x * x, axis=-1, keepdims=True)
    xn = (x * jax.lax.rsqrt(var + eps)) * ln_ref[...].astype(jnp.float32)
    h = jnp.dot(xn.astype(jnp.bfloat16), w1_ref[...].astype(jnp.bfloat16),
                preferred_element_type=jnp.float32)
    h = jnp.maximum(h + b1_ref[...].astype(jnp.float32), 0.0)  # (bm, bf) in VMEM only
    acc_ref[...] += jnp.dot(h.astype(jnp.bfloat16), w2_ref[...].astype(jnp.bfloat16),
                            preferred_element_type=jnp.float32)

    @pl.when(j == pl.num_programs(1) - 1)
    def _():
        o_ref[...] = (acc_ref[...] + b2_ref[...].astype(jnp.float32) + x).astype(o_ref.dtype)


def fused_ffn(x, ln_w, w1, b1, w2, b2, eps=1e-6):
    # out = x + relu(rmsnorm(x) @ w1 + b1) @ w2 + b2
    orig = x.shape
    D = orig[-1]
    FF = w1.shape[1]
    x2 = x.reshape(-1, D)
    M = x2.shape[0]
    bm = _pick_tile(M, (256, 128, 64, 32, 16, 8))
    bf = _pick_tile(FF, (512, 256, 128))
    out = pl.pallas_call(
        partial(_ffn_kernel, eps=eps),
        out_shape=jax.ShapeDtypeStruct((M, D), x.dtype),
        grid=(M // bm, FF // bf),
        in_specs=[pl.BlockSpec((bm, D), lambda i, j: (i, 0)),
                  pl.BlockSpec((1, D), lambda i, j: (0, 0)),
                  pl.BlockSpec((D, bf), lambda i, j: (0, j)),
                  pl.BlockSpec((1, bf), lambda i, j: (0, j)),
                  pl.BlockSpec((bf, D), lambda i, j: (j, 0)),
                  pl.BlockSpec((1, D), lambda i, j: (0, 0))],
        out_specs=pl.BlockSpec((bm, D), lambda i, j: (i, 0)),
        scratch_shapes=[pltpu.VMEM((bm, D), jnp.float32)],
        compiler_params=pltpu.CompilerParams(
            dimension_semantics=("parallel", "arbitrary"),
            vmem_limit_bytes=VMEM_LIMIT),
    )(x2, ln_w.reshape(1, D), w1, b1.reshape(1, FF), w2, b2.reshape(1, D))
    return out.reshape(orig)


def _attn_kernel(q_ref, k_ref, v_ref, bias_ref, o_ref, *maybe_attn, scale, return_attn):
    # All heads of one batch element per grid step; bf16 MXU operands, f32 softmax.
    q = q_ref[0].astype(jnp.bfloat16)                         # (H, Tq, Dh)
    k = k_ref[0].astype(jnp.bfloat16)                         # (H, Tk, Dh)
    v = v_ref[0].astype(jnp.bfloat16)                         # (H, Tk, Dh)
    s = jnp.einsum('hqd,hkd->hqk', q, k,
                   preferred_element_type=jnp.float32) * scale
    s = s + bias_ref[...].astype(jnp.float32)                 # shared (H,Tq,Tk) bias
    m = jnp.max(s, axis=-1, keepdims=True)
    p = jnp.exp(s - m)
    l = jnp.sum(p, axis=-1, keepdims=True)
    pn = p * pl.reciprocal(l, approx=True)                    # EUP reciprocal
    out = jnp.einsum('hqk,hkd->hqd', pn.astype(jnp.bfloat16), v,
                     preferred_element_type=jnp.float32)
    o_ref[0] = out.astype(o_ref.dtype)
    if return_attn:
        maybe_attn[0][0] = pn.astype(maybe_attn[0].dtype)


def attention(q, k, v, bias, scale, return_attn=False):
    # q: [B,H,Tq,Dh], k/v: [B,H,Tk,Dh], bias: [H,Tq,Tk] (shared across batch, no broadcast).
    # TODO(synk): flash-style Tk tiling + packed-head (lane-dense) output for long sequences.
    B, H, Tq, Dh = q.shape
    Tk = k.shape[2]
    o_spec = pl.BlockSpec((1, H, Tq, Dh), lambda b: (b, 0, 0, 0))
    if return_attn:
        out_shape = (jax.ShapeDtypeStruct((B, H, Tq, Dh), q.dtype),
                     jax.ShapeDtypeStruct((B, H, Tq, Tk), jnp.float32))
        out_specs = (o_spec, pl.BlockSpec((1, H, Tq, Tk), lambda b: (b, 0, 0, 0)))
    else:
        out_shape = jax.ShapeDtypeStruct((B, H, Tq, Dh), q.dtype)
        out_specs = o_spec

    res = pl.pallas_call(
        partial(_attn_kernel, scale=scale, return_attn=return_attn),
        out_shape=out_shape,
        grid=(B,),
        in_specs=[pl.BlockSpec((1, H, Tq, Dh), lambda b: (b, 0, 0, 0)),
                  pl.BlockSpec((1, H, Tk, Dh), lambda b: (b, 0, 0, 0)),
                  pl.BlockSpec((1, H, Tk, Dh), lambda b: (b, 0, 0, 0)),
                  pl.BlockSpec((H, Tq, Tk), lambda b: (0, 0, 0))],
        out_specs=out_specs,
        compiler_params=pltpu.CompilerParams(
            dimension_semantics=("parallel",), vmem_limit_bytes=VMEM_LIMIT),
    )(q, k, v, bias.astype(jnp.float32))
    if return_attn:
        return res[0], res[1]
    return res, None


# ----------------------------- model glue (plain JAX) -----------------------------

MAX_REL = 16  # relative-position clipping window


def rel_pos_bias(table, q_pos, k_pos):
    # table: [H, 2*MAX_REL+1] -> bias [H, Tq, Tk]
    rel = k_pos[None, :] - q_pos[:, None]
    rel = jnp.clip(rel, -MAX_REL, MAX_REL) + MAX_REL
    return table[:, rel]


def split_heads(x, H):
    B, T, D = x.shape
    return x.reshape(B, T, H, D // H).transpose(0, 2, 1, 3)


def merge_heads(x):
    B, H, T, Dh = x.shape
    return x.transpose(0, 2, 1, 3).reshape(B, T, H * Dh)


def decoder_layer_forward(lp, tgt, memory, dec_slf_bias, enc_dec_bias, H,
                          return_attn=False):
    D = tgt.shape[-1]
    Dh = D // H
    scale = 1.0 / math.sqrt(Dh)

    # --- masked self-attention (fused pre-norm + QKV projection, residual fused in o-proj) ---
    qkv = fused_norm_linear(tgt, lp["sa_ln_w"], lp["sa_qkv_w"], lp["sa_qkv_b"])
    q = split_heads(qkv[..., :D], H)
    k = split_heads(qkv[..., D:2 * D], H)
    v = split_heads(qkv[..., 2 * D:], H)
    ao, _ = attention(q, k, v, dec_slf_bias, scale, return_attn=False)
    x = linear(merge_heads(ao), lp["sa_o_w"], lp["sa_o_b"], residual=tgt)

    # --- encoder-decoder cross attention (fused norm+Q, fused K/V of memory) ---
    qc = split_heads(fused_norm_linear(x, lp["ca_ln_w"], lp["ca_q_w"], lp["ca_q_b"]), H)
    kv = linear(memory, lp["ca_kv_w"], lp["ca_kv_b"])
    km = split_heads(kv[..., :D], H)
    vm = split_heads(kv[..., D:], H)
    ao, enc_dec_attn = attention(qc, km, vm, enc_dec_bias, scale, return_attn=return_attn)
    x = linear(merge_heads(ao), lp["ca_o_w"], lp["ca_o_b"], residual=x)

    # --- feed-forward (fused norm + ff1 + relu + ff2 + residual) ---
    x = fused_ffn(x, lp["ff_ln_w"], lp["ff1_w"], lp["ff1_b"], lp["ff2_w"], lp["ff2_b"])
    return x, enc_dec_attn


def transformer_decoder_forward(params, output, memory, return_attns=False,
                                enc_position=None, dec_position=None):
    # output = self.layer_norm(output); output = self.dropout(output)   (dropout = eval identity)
    output = rmsnorm(output, params["ln_w"])

    B, T, D = output.shape
    S = memory.shape[1]
    if dec_position is None:
        dec_position = jnp.arange(T, dtype=jnp.int32)
    if enc_position is None:
        enc_position = jnp.arange(S, dtype=jnp.int32)

    # position biases computed once (layer 0) and reused by subsequent layers
    dec_slf_bias = rel_pos_bias(params["slf_bias_table"], dec_position, dec_position)
    # causal mask for decoder self-attention (assumed decoder-layer semantics)
    causal = jnp.where(dec_position[None, :] > dec_position[:, None], -1e9, 0.0)
    dec_slf_bias = dec_slf_bias + causal[None, :, :]
    enc_dec_bias = rel_pos_bias(params["cross_bias_table"], dec_position, enc_position)

    n_layers = params["n_layers"]
    enc_dec_attn = None
    for i in range(n_layers):
        want_attn = return_attns and (i == n_layers - 1)   # only the last layer's attn is returned
        output, attn_i = decoder_layer_forward(
            params["layers"][i], output, memory, dec_slf_bias, enc_dec_bias,
            params["H"], return_attn=want_attn)
        if want_attn:
            enc_dec_attn = attn_i

    # same layer_norm module applied again (matches the reference)
    output = rmsnorm(output, params["ln_w"])
    if return_attns:
        return output, enc_dec_attn
    return output


# ----------------------------- deterministic param init -----------------------------

def init_params(key, n_layers, D, H, FF):
    def nrm(k, shape):
        return (0.02 * jax.random.normal(k, shape)).astype(jnp.float32)

    keys = jax.random.split(key, 2 + n_layers)
    params = {
        "n_layers": n_layers,
        "H": H,
        "ln_w": jnp.ones((D,), jnp.float32),                       # T5 LayerNorm weight
        "slf_bias_table": nrm(keys[0], (H, 2 * MAX_REL + 1)),
        "cross_bias_table": nrm(keys[1], (H, 2 * MAX_REL + 1)),
        "layers": [],
    }
    for li in range(n_layers):
        lk = jax.random.split(keys[2 + li], 12)
        lp = {
            "sa_ln_w": jnp.ones((D,), jnp.float32),
            # fused QKV projection
            "sa_qkv_w": jnp.concatenate(
                [nrm(lk[0], (D, D)), nrm(lk[1], (D, D)), nrm(lk[2], (D, D))], axis=1),
            "sa_qkv_b": jnp.zeros((3 * D,), jnp.float32),
            "sa_o_w": nrm(lk[3], (D, D)), "sa_o_b": jnp.zeros((D,), jnp.float32),
            "ca_ln_w": jnp.ones((D,), jnp.float32),
            "ca_q_w": nrm(lk[4], (D, D)), "ca_q_b": jnp.zeros((D,), jnp.float32),
            # fused cross K/V projection
            "ca_kv_w": jnp.concatenate([nrm(lk[5], (D, D)), nrm(lk[6], (D, D))], axis=1),
            "ca_kv_b": jnp.zeros((2 * D,), jnp.float32),
            "ca_o_w": nrm(lk[7], (D, D)), "ca_o_b": jnp.zeros((D,), jnp.float32),
            "ff_ln_w": jnp.ones((D,), jnp.float32),
            "ff1_w": nrm(lk[8], (D, FF)), "ff1_b": jnp.zeros((FF,), jnp.float32),
            "ff2_w": nrm(lk[9], (FF, D)), "ff2_b": jnp.zeros((D,), jnp.float32),
        }
        params["layers"].append(lp)
    return params


# ----------------------------- main -----------------------------

if __name__ == "__main__":
    B, T, S, D, H, FF = 2, 8, 8, 32, 4, 64
    n_layers = 2

    key = jax.random.PRNGKey(0)
    k_out, k_mem, k_param = jax.random.split(key, 3)

    output = jax.random.normal(k_out, (B, T, D), dtype=jnp.float32)   # tgt  [B, T, D]
    memory = jax.random.normal(k_mem, (B, S, D), dtype=jnp.float32)   # mem  [B, S, D]
    params = init_params(k_param, n_layers, D, H, FF)

    y = transformer_decoder_forward(params, output, memory, return_attns=False)
    y = jax.block_until_ready(y)

    y2, attn = transformer_decoder_forward(params, output, memory, return_attns=True)
    jax.block_until_ready((y2, attn))

    assert y.shape == (B, T, D)
    assert attn.shape == (B, H, T, S)
    assert bool(jnp.all(jnp.isfinite(y)))
    assert bool(jnp.all(jnp.isfinite(attn)))

    print("KERNEL_OK")
</pallas_src>

<mosaic_0001>
module attributes {stable_mosaic.version = 11 : i64} {
  func.func @_rmsnorm_kernel(%arg0: i32, %arg1: memref<16x32xf32, #tpu.memory_space<vmem>>, %arg2: memref<1x32xf32, #tpu.memory_space<vmem>>, %arg3: memref<16x32xf32, #tpu.memory_space<vmem>>) attributes {dimension_semantics = [#tpu.dimension_semantics<parallel>], iteration_bounds = array<i64: 1>, scalar_prefetch = 0 : i64, scratch_operands = 0 : i64, tpu.core_type = #tpu.core_type<tc>, window_params = [{transform_indices = @transform_0, window_bounds = array<i64: 16, 32>}, {pipeline_mode = #tpu.pipeline_mode<synchronous>, transform_indices = @transform_1, window_bounds = array<i64: 1, 32>}, {transform_indices = @transform_2, window_bounds = array<i64: 16, 32>}]} {
    %c0 = arith.constant 0 : index
    %c0_0 = arith.constant 0 : index
    %0 = vector.load %arg1[%c0, %c0_0] : memref<16x32xf32, #tpu.memory_space<vmem>>, vector<16x32xf32>
    %1 = arith.mulf %0, %0 : vector<16x32xf32>
    %cst = arith.constant dense<0.000000e+00> : vector<16xf32>
    %2 = vector.multi_reduction <add>, %1, %cst [1] : vector<16x32xf32> to vector<16xf32>
    %3 = vector.shape_cast %2 : vector<16xf32> to vector<16x1xf32>
    %cst_1 = arith.constant 3.200000e+01 : f32
    %4 = vector.broadcast %cst_1 : f32 to vector<16x1xf32>
    %5 = arith.divf %3, %4 : vector<16x1xf32>
    %cst_2 = arith.constant 9.99999997E-7 : f32
    %6 = vector.broadcast %cst_2 : f32 to vector<16x1xf32>
    %7 = arith.addf %5, %6 : vector<16x1xf32>
    %8 = math.rsqrt %7 : vector<16x1xf32>
    %9 = vector.broadcast %8 : vector<16x1xf32> to vector<16x32xf32>
    %10 = arith.mulf %0, %9 : vector<16x32xf32>
    %c0_3 = arith.constant 0 : index
    %c0_4 = arith.constant 0 : index
    %11 = vector.load %arg2[%c0_3, %c0_4] : memref<1x32xf32, #tpu.memory_space<vmem>>, vector<1x32xf32>
    %12 = vector.broadcast %11 : vector<1x32xf32> to vector<16x32xf32>
    %13 = arith.mulf %12, %10 : vector<16x32xf32>
    %c0_5 = arith.constant 0 : index
    %c0_6 = arith.constant 0 : index
    %14 = vector.load %arg3[%c0_5, %c0_6] : memref<16x32xf32, #tpu.memory_space<vmem>>, vector<16x32xf32>
    tpu.vector_store %arg3[%c0_5, %c0_6], %13 {strides = array<i32>} : memref<16x32xf32, #tpu.memory_space<vmem>>, vector<16x32xf32>,
    return
  }
  func.func @transform_0(%arg0: i32) -> (i32, i32) {
    %c0_i32 = arith.constant 0 : i32
    %c0_i32_0 = arith.constant 0 : i32
    return %arg0, %c0_i32 : i32, i32
  }
  func.func @transform_1(%arg0: i32) -> (i32, i32) {
    %c0_i32 = arith.constant 0 : i32
    %c0_i32_0 = arith.constant 0 : i32
    %c0_i32_1 = arith.constant 0 : i32
    return %c0_i32, %c0_i32_0 : i32, i32
  }
  func.func @transform_2(%arg0: i32) -> (i32, i32) {
    %c0_i32 = arith.constant 0 : i32
    %c0_i32_0 = arith.constant 0 : i32
    return %arg0, %c0_i32 : i32, i32
  }
}

</mosaic_0001>

<bundles_post_ra>
// kernel: tpu_custom_call.1
= control target key start
LH: loop header
LB: loop body
LE: loop exit
PB: predicated region body
PF: predicated region fallthrough
CT: control target
= control target key end

     0   :  { %7 = vsyncpa [#allocation3], 0  ;;  %s235_s0 = inlined_call_operand.hbm [shape: f32[16,32], index: 0, kind: input, shape index: {}]   ;;  %s236_s1 = inlined_call_operand.hbm [shape: f32[1,32], index: 1, kind: input, shape index: {}]   ;;  %s237_s2 = inlined_call_operand.hbm [shape: f32[16,32], index: 2, kind: output, shape index: {}]  }
   0x1   :  { %8 = vsyncpa [#allocation6], 0 }
   0x2   :  { %9 = vsyncpa [#allocation4], 0  ;;  %s169_s9 = smov [#allocation2]   ;;  %s97_s13 = scalar_lea.hbm %s235_s0, 256 }
   0x3   :  { %s15_s10 = sshll.u32 %s169_s9, 4  ;;  %p98_p0 = scmp.ne.s32.totalorder %s235_s0, %s97_s13  ;;  %s16_s10 = int_to_ptr.vmem [resolvable:$true] %s15_s10 }
   0x4   :  { %p101_p1 = scmp.lt.u32.totalorder %s97_s13, %s235_s0 }
   0x6   :  { %p103_p2 = pnand %p101_p1, %p98_p0 }
   0x8   :  { %106 = shalt.err (!%p103_p2)
}
   0x9   :  { %s107_s18 = scalar_lea.vmem %s16_s10, 256  ;;  %p112_p4 = scmp.lt.s32.totalorder %s16_s10, %s16_s10 }
   0xa   :  { %p108_p3 = scmp.ne.s32.totalorder %s16_s10, %s107_s18  ;;  %p113_p5 = scmp.lt.s32.totalorder %s107_s18, %s107_s18 }
   0xc   :  { %p114_p6 = por %p113_p5, %p112_p4 }
   0xe   :  { %p115_p7 = pnand %p114_p6, %p108_p3 }
  0x10   :  { %118 = shalt.err (!%p115_p7)
}
  0x11   :  { %s170_s19 = smov 128   ;;  %s171_s20 = smov 8  }
  0x12   :  { %21 = dma.hbm_to_vmem [thread:$0]  %s235_s0, 256, %s16_s10, [#allocation3], %s170_s19, %s170_s19, %s171_s20  }
  0x13   :  { %s172_s23 = smov [#allocation5]   ;;  %s119_s27 = scalar_lea.hbm %s236_s1, 16 }
  0x14   :  { %s28_s24 = sshll.u32 %s172_s23, 4  ;;  %p120_p8 = scmp.ne.s32.totalorder %s236_s1, %s119_s27  ;;  %s29_s24 = int_to_ptr.vmem [resolvable:$true] %s28_s24 }
  0x15   :  { %p123_p9 = scmp.lt.u32.totalorder %s119_s27, %s236_s1 }
  0x17   :  { %p125_p10 = pnand %p123_p9, %p120_p8 }
  0x19   :  { %128 = shalt.err (!%p125_p10)
}
  0x1a   :  { %s129_s4 = scalar_lea.vmem %s29_s24, 16  ;;  %s133_s0 = scalar_lea.vmem %s29_s24, 32 }
  0x1b   :  { %p130_p11 = scmp.ne.s32.totalorder %s29_s24, %s129_s4  ;;  %p134_p12 = scmp.lt.s32.totalorder %s29_s24, %s29_s24 }
  0x1c   :  { %p135_p13 = scmp.lt.s32.totalorder %s133_s0, %s129_s4 }
  0x1e   :  { %p136_p0 = por %p135_p13, %p134_p12 }
  0x20   :  { %p137_p1 = pnand %p136_p0, %p130_p11 }
  0x22   :  { %140 = shalt.err (!%p137_p1)
}
  0x23   :  { %31 = dma.hbm_to_vmem [thread:$0]  %s236_s1, 16, %s29_s24, [#allocation6]  }
  0x24   :  { %163 = dma.done.wait [#allocation3], 256  }
  0x25   :  { %164 = vsyncadd [#allocation3], 4294967040 }
  0x26   :  { %165 = dma.done.wait [#allocation6], 16  }
  0x27   :  { %166 = vsyncadd [#allocation6], 4294967280  ;;  %v38_v0 = vld [vmem:[#allocation2] sm:$0xff]  ;;  %vm42_vm0 = vcmask 261120   ;;  %v39_v1 = vld [vmem:[#allocation2 + $0x8] sm:$0xff]  ;;  %s173_s1 = smov [#allocation7]  }
  0x28   :  { %v40_v2 = vmul.f32 %v38_v0, %v38_v0  ;;  %v41_v3 = vmul.f32 %v39_v1, %v39_v1  ;;  %v87_v13 = vld [vmem:[#allocation5] ss:$0 sm:$0xff]  ;;  %s74_s7 = sshll.u32 %s173_s1, 4  ;;  %s75_s7 = int_to_ptr.vmem [resolvable:$true] %s74_s7 }
  0x29   :  { %s141_s8 = scalar_lea.vmem %s75_s7, 256  ;;  %p146_p3 = scmp.lt.s32.totalorder %s75_s7, %s75_s7 }
  0x2a   :  { %v43_v4 = vsel %vm42_vm0, %v40_v2, 0.0  ;;  %v46_v5 = vsel %vm42_vm0, %v41_v3, 0.0  ;;  %p142_p2 = scmp.ne.s32.totalorder %s75_s7, %s141_s8  ;;  %p147_p4 = scmp.lt.s32.totalorder %s141_s8, %s141_s8 }
  0x2b   :  { %44 = vadd.xlane.f32.xlu0 %v43_v4 }
  0x2c   :  { %p148_p5 = por %p147_p4, %p146_p3 }
  0x2e   :  { %p149_p6 = pnand %p148_p5, %p142_p2 }
  0x2f   :  { %47 = vadd.xlane.f32.xlu0 %v46_v5 }
  0xb8   :  { %v45_v6 = vpop.xlane.xlu0 %44 }
  0xb9   :  { %v50_v7 = vmul.f32 0.03125, %v45_v6 }
  0xbb   :  { %v52_v8 = vadd.f32 1e-06, %v50_v7 }
  0xbc   :  { %v48_v9 = vpop.xlane.xlu0 %47 }
  0xbd   :  { %93 = vrsqrt.f32 %v52_v8  ;;  %v51_v10 = vmul.f32 0.03125, %v48_v9 }
  0xbf   :  { %v53_v11 = vadd.f32 1e-06, %v51_v10 }
  0xc1   :  { %95 = vrsqrt.f32 %v53_v11 }
  0xc7   :  { %v94_v12 = vpop.eup %93 }
  0xc8   :  { %v56_v14 = vmul.f32 %v94_v12, %v38_v0 }
  0xca   :  { %v65_v15 = vmul.f32 %v87_v13, %v56_v14 }
  0xcb   :  { %v96_v16 = vpop.eup %95 }
  0xcc   :  { %v57_v17 = vmul.f32 %v96_v16, %v39_v1  ;;  %67 = vst.msk [vmem:[#allocation7] sm:$0xff] %vm42_vm0, %v65_v15 }
  0xce   :  { %v66_v18 = vmul.f32 %v87_v13, %v57_v17 }
  0xd0   :  { %68 = vst.msk [vmem:[#allocation7 + $0x8] sm:$0xff] %vm42_vm0, %v66_v18 }
  0xd1   :  { %152 = shalt.err (!%p149_p6)
}
  0xd2   :  { %s153_s11 = scalar_lea.hbm %s237_s2, 256 }
  0xd3   :  { %p154_p7 = scmp.ne.s32.totalorder %s237_s2, %s153_s11  ;;  %p157_p8 = scmp.lt.u32.totalorder %s153_s11, %s237_s2 }
  0xd5   :  { %p159_p9 = pnand %p157_p8, %p154_p7 }
  0xd7   :  { %162 = shalt.err (!%p159_p9)
}
  0xd8   :  { %80 = dma.vmem_to_hbm [thread:$0]  %s75_s7, 256, %s237_s2, [#allocation4], %s170_s19, %s170_s19, %s171_s20  }
  0xd9   :  { %167 = dma.done.wait [#allocation4], 256  }
  0xda   :  { %168 = vsyncadd [#allocation4], 4294967040 }
  0xdb   :  { %84 = vsyncpa [#allocation3], 1 }
  0xdc   :  { %85 = vsyncpa [#allocation6], 1 }
  0xdd   :  { %86 = vsyncpa [#allocation4], 1 }

</bundles_post_ra>
